<compile_context>
chip_gen: v7x
topology: tpu7x:2x2x1
jax: 0.10.0
libtpu: 0.0.40
codegen_flags: <defaults>
</compile_context>

<pallas_src>
import jax
import jax.numpy as jnp
from jax.experimental import pallas as pl
from jax.experimental.pallas import tpu as pltpu


# --------------------------------------------------------------------------- #
# Kernel
# --------------------------------------------------------------------------- #
def _mlp_kernel(xT_ref, wbig_ref, w2T_ref, woT_ref, bo_ref, yT_ref):
    """One batch tile, transposed layout (batch in the lane dimension).

    Per-tile shapes (Bt = batch tile, multiple of 128; F = n_features,
    H = n_hidden, O = n_out):
      xT   : (F+1, Bt)  bf16   streamed x^T, last row == 1.0 (folded biases)
      wbig : (2H, F+1)  bf16   [[W_h1.T | b_h1], [0..W_h2_ctx.T | b_h2]]  (pinned)
      w2T  : (H, H)     bf16   W_h2[:H].T                                 (pinned)
      woT  : (O, H)     bf16   W_o.T                                      (pinned)
      bo   : (O, 1)     f32                                               (pinned)
      yT   : (O, Bt)    f32    streamed y^T (lane-dense store)
    """
    H = w2T_ref.shape[0]

    # One MXU pass yields both h1_pre (+b_h1) and ctx_term (+b_h2).
    big = jnp.dot(wbig_ref[...], xT_ref[...],
                  preferred_element_type=jnp.float32)        # (2H, Bt) f32

    h1 = jnp.maximum(big[:H, :], 0.0)                        # (H, Bt) f32
    ctx_b2 = big[H:, :]                                      # ctx_term + b_h2

    h2 = jnp.dot(w2T_ref[...], h1.astype(w2T_ref.dtype),
                 preferred_element_type=jnp.float32)         # (H, Bt) f32
    h2 = jnp.maximum(h2 + ctx_b2, 0.0)

    y = jnp.dot(woT_ref[...], h2.astype(woT_ref.dtype),
                preferred_element_type=jnp.float32)          # (O, Bt) f32
    yT_ref[...] = (y + bo_ref[...]).astype(yT_ref.dtype)     # lane-dense store


# --------------------------------------------------------------------------- #
# Wrapper
# --------------------------------------------------------------------------- #
def _round_up(n, m):
    return ((n + m - 1) // m) * m


def _default_max_tile():
    """Per-generation cap on the batch tile (lanes)."""
    try:
        kind = jax.devices()[0].device_kind.lower()
    except Exception:
        return 8192
    if "v7" in kind:
        return 16384          # 3.2 TB/s HBM, but only 64 MiB VMEM/TC
    if "v6" in kind or "trillium" in kind:
        return 16384          # ~1 MiB streamed / step vs 1.4 TB/s HBM
    return 8192               # v5e & unknown: 1 vst slot, modest scoped VMEM


def _choose_batch_tile(batch, max_tile):
    """Target ~8 grid steps (pipelining + 2-TC balance) and bound padding."""
    target_steps = 8
    bt = _round_up(max(pl.cdiv(max(batch, 1), target_steps), 128), 128)
    return min(bt, max_tile)


def scaled_net_2hidden_2ctx_forward(x, params, *, max_batch_tile=None,
                                    use_bf16=True, out_dtype=jnp.float32,
                                    transposed_io=False):
    """Forward pass of ScaledNet2Hidden2Ctx as a Pallas TPU kernel.

    x: (B, n_features) by default; (n_features, B) if transposed_io=True
       (transposed IO skips the host-side transposes entirely).
    """
    n_features, n_hidden = params["W_h1"].shape
    n_out = params["W_o"].shape[1]
    F, H, O = n_features, n_hidden, n_out

    if transposed_io:
        xT_in = jnp.reshape(x, (F, -1)).astype(jnp.float32)
        batch = xT_in.shape[1]
    else:
        x2d = jnp.reshape(x, (-1, F)).astype(jnp.float32)
        batch = x2d.shape[0]
        xT_in = x2d.T

    if batch == 0:
        return jnp.zeros((O, 0) if transposed_io else (0, O), out_dtype)

    mxu_dtype = jnp.bfloat16 if use_bf16 else jnp.float32

    # Batch tiling: lane-dense tiles (multiple of 128), ~8 steps, padding-capped.
    max_tile = max_batch_tile if max_batch_tile is not None else _default_max_tile()
    bt = _choose_batch_tile(batch, max_tile)
    b_pad = _round_up(batch, bt)

    # Single fused cast+pad.  The extra bottom row is the ones row used to fold
    # the biases into the MXU matmul; padded batch columns also get 1.0 (their
    # outputs are garbage and sliced off below).
    xT = jnp.pad(xT_in.astype(mxu_dtype),
                 ((0, 1), (0, b_pad - batch)), constant_values=1.0)   # (F+1, b_pad)

    # --- weight packing --------------------------------------------------- #
    # W_big (2H, F+1):
    #   rows 0..H-1 :  [ W_h1.T | b_h1 ]
    #   rows H..2H-1:  [ 0 ... 0 | W_h2_ctx.T | b_h2 ]
    w1T = params["W_h1"].T                                   # (H, F)
    b1 = params["b_h1"].reshape(H, 1)
    top = jnp.concatenate([w1T, b1], axis=1)                 # (H, F+1)
    w2cT = params["W_h2"][H:, :].T                           # (H, 2)
    b2 = params["b_h2"].reshape(H, 1)
    bottom = jnp.concatenate(
        [jnp.zeros((H, F - 2), jnp.float32), w2cT, b2], axis=1)  # (H, F+1)
    wbig = jnp.concatenate([top, bottom], axis=0).astype(mxu_dtype)  # (2H, F+1)

    w2T = params["W_h2"][:H, :].T.astype(mxu_dtype)          # (H, H)
    woT = params["W_o"].T.astype(mxu_dtype)                  # (O, H)
    bo = params["b_o"].reshape(O, 1).astype(jnp.float32)     # (O, 1)

    pinned = lambda i: (0, 0)   # weights stay VMEM-resident across the grid

    yT = pl.pallas_call(
        _mlp_kernel,
        out_shape=jax.ShapeDtypeStruct((O, b_pad), out_dtype),
        grid=(b_pad // bt,),
        in_specs=[
            pl.BlockSpec((F + 1, bt), lambda i: (0, i)),     # streamed x^T
            pl.BlockSpec((2 * H, F + 1), pinned),            # W_big
            pl.BlockSpec((H, H), pinned),                    # W_h2[:H].T
            pl.BlockSpec((O, H), pinned),                    # W_o.T
            pl.BlockSpec((O, 1), pinned),                    # b_o
        ],
        out_specs=pl.BlockSpec((O, bt), lambda i: (0, i)),   # streamed y^T
        compiler_params=pltpu.CompilerParams(
            dimension_semantics=("parallel",),        # shard batch tiles across TCs
            vmem_limit_bytes=32 * 1024 * 1024,        # big tiles OK on v5e's 16MiB default
        ),
    )(xT, wbig, w2T, woT, bo)

    if transposed_io:
        return yT[:, :batch]                                  # (O, B)
    return yT[:, :batch].T                                    # (B, O)


# --------------------------------------------------------------------------- #
# Parameter init mirroring the module __init__
# --------------------------------------------------------------------------- #
def init_params(key, n_features, n_hidden, n_out,
                weight_init=0.01, ctx_w_init=0.5):
    k1, k2, k3, k4, k5 = jax.random.split(key, 5)
    W_h1_in = jax.random.normal(k1, (n_features - 2, n_hidden), jnp.float32) * weight_init
    W_h1_c = jax.random.normal(k2, (2, n_hidden), jnp.float32) * ctx_w_init
    W_h2_in = jax.random.normal(k3, (n_hidden, n_hidden), jnp.float32) * weight_init
    W_h2_c = jax.random.normal(k4, (2, n_hidden), jnp.float32) * ctx_w_init
    W_o = jax.random.normal(k5, (n_hidden, n_out), jnp.float32) * weight_init
    return {
        "W_h1": jnp.concatenate([W_h1_in, W_h1_c], axis=0),   # (n_features, n_hidden)
        "b_h1": jnp.zeros((n_hidden,), jnp.float32) + 0.1,
        "W_h2": jnp.concatenate([W_h2_in, W_h2_c], axis=0),   # (n_hidden + 2, n_hidden)
        "b_h2": jnp.zeros((n_hidden,), jnp.float32) + 0.1,
        "W_o": W_o,                                            # (n_hidden, n_out)
        "b_o": jnp.zeros((n_out,), jnp.float32),
    }


# --------------------------------------------------------------------------- #
# References
# --------------------------------------------------------------------------- #
def _reference_forward_f32(x, params, n_features):
    """Pure-JAX f32 reference identical to the PyTorch forward."""
    x2d = jnp.reshape(x, (-1, n_features)).astype(jnp.float32)
    y_h1 = jax.nn.relu(x2d @ params["W_h1"] + params["b_h1"])
    h2_in = jnp.concatenate([y_h1, x2d[:, -2:]], axis=1)
    y_h2 = jax.nn.relu(h2_in @ params["W_h2"] + params["b_h2"])
    return y_h2 @ params["W_o"] + params["b_o"]


def _reference_forward_matched(x, params, n_features, use_bf16=True):
    """Pure-JAX reference mirroring the kernel's exact precision pattern
    (bf16 MXU operands incl. folded biases/context weights, f32 accumulation)."""
    dt = jnp.bfloat16 if use_bf16 else jnp.float32
    F = n_features
    H = params["W_h1"].shape[1]
    x2d = jnp.reshape(x, (-1, F)).astype(jnp.float32)
    x_aug = jnp.concatenate(
        [x2d, jnp.ones((x2d.shape[0], 1), jnp.float32)], axis=1).astype(dt)
    top = jnp.concatenate([params["W_h1"], params["b_h1"][None, :]], axis=0)  # (F+1, H)
    bottom = jnp.concatenate(
        [jnp.zeros((F - 2, H), jnp.float32),
         params["W_h2"][H:, :],
         params["b_h2"][None, :]], axis=0)                                    # (F+1, H)
    wbig = jnp.concatenate([top, bottom], axis=1).astype(dt)                  # (F+1, 2H)
    big = jnp.dot(x_aug, wbig, preferred_element_type=jnp.float32)            # (B, 2H)
    h1 = jnp.maximum(big[:, :H], 0.0)
    ctx_b2 = big[:, H:]
    h2 = jnp.dot(h1.astype(dt), params["W_h2"][:H, :].astype(dt),
                 preferred_element_type=jnp.float32)
    h2 = jnp.maximum(h2 + ctx_b2, 0.0)
    y = jnp.dot(h2.astype(dt), params["W_o"].astype(dt),
                preferred_element_type=jnp.float32)
    return y + params["b_o"]


# --------------------------------------------------------------------------- #
# Demo / correctness check
# --------------------------------------------------------------------------- #
if __name__ == "__main__":
    # TODO(synk): the module's caching of intermediates (self.x_h1, self.y_h1,
    # self.x_h2, self.y_h2, self.y) is not reproduced; only the forward output is.
    n_features = 16      # 14 stimulus features + 2 context units
    n_hidden = 32
    n_out = 8

    key = jax.random.PRNGKey(0)
    k_param, k_x1, k_x2 = jax.random.split(key, 3)
    params = init_params(k_param, n_features, n_hidden, n_out)

    # --- small single-tile batch ------------------------------------------
    batch = 8
    x = jax.random.normal(k_x1, (batch, n_features), jnp.float32)
    y = scaled_net_2hidden_2ctx_forward(x, params, use_bf16=True)
    y = jax.block_until_ready(y)
    assert y.shape == (batch, n_out)

    y_matched = _reference_forward_matched(x, params, n_features, use_bf16=True)
    assert jnp.allclose(y, y_matched, atol=1e-4, rtol=1e-3), \
        "mismatch vs matched-precision reference"
    y_f32 = _reference_forward_f32(x, params, n_features)
    assert jnp.allclose(y, y_f32, atol=5e-2, rtol=5e-2), "mismatch vs f32 reference"

    # --- multi-tile batch (exercises grid + padding slice) ------------------
    batch2 = 300
    x2 = jax.random.normal(k_x2, (batch2, n_features), jnp.float32)
    y2 = jax.block_until_ready(
        scaled_net_2hidden_2ctx_forward(x2, params, use_bf16=True))
    assert y2.shape == (batch2, n_out)
    y2_matched = _reference_forward_matched(x2, params, n_features, use_bf16=True)
    assert jnp.allclose(y2, y2_matched, atol=1e-4, rtol=1e-3), \
        "mismatch vs matched-precision reference (multi-tile)"

    print("KERNEL_OK")
</pallas_src>

<mosaic_0001>
module attributes {stable_mosaic.version = 11 : i64} {
  func.func @_mlp_kernel(%arg0: i32, %arg1: memref<17x128xbf16, #tpu.memory_space<vmem>>, %arg2: memref<64x17xbf16, #tpu.memory_space<vmem>>, %arg3: memref<32x32xbf16, #tpu.memory_space<vmem>>, %arg4: memref<8x32xbf16, #tpu.memory_space<vmem>>, %arg5: memref<8x1xf32, #tpu.memory_space<vmem>>, %arg6: memref<8x128xf32, #tpu.memory_space<vmem>>) attributes {dimension_semantics = [#tpu.dimension_semantics<parallel>], iteration_bounds = array<i64: 1>, scalar_prefetch = 0 : i64, scratch_operands = 0 : i64, tpu.core_type = #tpu.core_type<tc>, window_params = [{transform_indices = @transform_0, window_bounds = array<i64: 17, 128>}, {pipeline_mode = #tpu.pipeline_mode<synchronous>, transform_indices = @transform_1, window_bounds = array<i64: 64, 17>}, {pipeline_mode = #tpu.pipeline_mode<synchronous>, transform_indices = @transform_2, window_bounds = array<i64: 32, 32>}, {pipeline_mode = #tpu.pipeline_mode<synchronous>, transform_indices = @transform_3, window_bounds = array<i64: 8, 32>}, {pipeline_mode = #tpu.pipeline_mode<synchronous>, transform_indices = @transform_4, window_bounds = array<i64: 8, 1>}, {transform_indices = @transform_5, window_bounds = array<i64: 8, 128>}]} {
    %c0 = arith.constant 0 : index
    %c0_0 = arith.constant 0 : index
    %0 = vector.load %arg2[%c0, %c0_0] : memref<64x17xbf16, #tpu.memory_space<vmem>>, vector<64x17xbf16>
    %c0_1 = arith.constant 0 : index
    %c0_2 = arith.constant 0 : index
    %1 = vector.load %arg1[%c0_1, %c0_2] : memref<17x128xbf16, #tpu.memory_space<vmem>>, vector<17x128xbf16>
    %cst = arith.constant dense<0.000000e+00> : vector<64x128xf32>
    %2 = tpu.matmul %0, %1, %cst {dimension_numbers = #tpu.dot_dimension_numbers<[1], [0], [0], [1], [0, 0, 1, 1], [], []>} : vector<64x17xbf16>, vector<17x128xbf16>, vector<64x128xf32> -> vector<64x128xf32>
    %3 = vector.extract_strided_slice %2 {offsets = [0, 0], sizes = [32, 128], strides = [1, 1]} : vector<64x128xf32> to vector<32x128xf32>
    %cst_3 = arith.constant 0.000000e+00 : f32
    %4 = vector.broadcast %cst_3 : f32 to vector<32x128xf32>
    %5 = arith.maximumf %3, %4 : vector<32x128xf32>
    %6 = vector.extract_strided_slice %2 {offsets = [32, 0], sizes = [32, 128], strides = [1, 1]} : vector<64x128xf32> to vector<32x128xf32>
    %c0_4 = arith.constant 0 : index
    %c0_5 = arith.constant 0 : index
    %7 = vector.load %arg3[%c0_4, %c0_5] : memref<32x32xbf16, #tpu.memory_space<vmem>>, vector<32x32xbf16>
    %8 = arith.truncf %5 : vector<32x128xf32> to vector<32x128xbf16>
    %cst_6 = arith.constant dense<0.000000e+00> : vector<32x128xf32>
    %9 = tpu.matmul %7, %8, %cst_6 {dimension_numbers = #tpu.dot_dimension_numbers<[1], [0], [0], [1], [0, 0, 1, 1], [], []>} : vector<32x32xbf16>, vector<32x128xbf16>, vector<32x128xf32> -> vector<32x128xf32>
    %10 = arith.addf %9, %6 : vector<32x128xf32>
    %cst_7 = arith.constant 0.000000e+00 : f32
    %11 = vector.broadcast %cst_7 : f32 to vector<32x128xf32>
    %12 = arith.maximumf %10, %11 : vector<32x128xf32>
    %c0_8 = arith.constant 0 : index
    %c0_9 = arith.constant 0 : index
    %13 = vector.load %arg4[%c0_8, %c0_9] : memref<8x32xbf16, #tpu.memory_space<vmem>>, vector<8x32xbf16>
    %14 = arith.truncf %12 : vector<32x128xf32> to vector<32x128xbf16>
    %cst_10 = arith.constant dense<0.000000e+00> : vector<8x128xf32>
    %15 = tpu.matmul %13, %14, %cst_10 {dimension_numbers = #tpu.dot_dimension_numbers<[1], [0], [0], [1], [0, 0, 1, 1], [], []>} : vector<8x32xbf16>, vector<32x128xbf16>, vector<8x128xf32> -> vector<8x128xf32>
    %c0_11 = arith.constant 0 : index
    %c0_12 = arith.constant 0 : index
    %16 = vector.load %arg5[%c0_11, %c0_12] : memref<8x1xf32, #tpu.memory_space<vmem>>, vector<8x1xf32>
    %17 = vector.broadcast %16 : vector<8x1xf32> to vector<8x128xf32>
    %18 = arith.addf %15, %17 : vector<8x128xf32>
    %c0_13 = arith.constant 0 : index
    %c0_14 = arith.constant 0 : index
    %19 = vector.load %arg6[%c0_13, %c0_14] : memref<8x128xf32, #tpu.memory_space<vmem>>, vector<8x128xf32>
    tpu.vector_store %arg6[%c0_13, %c0_14], %18 {strides = array<i32>} : memref<8x128xf32, #tpu.memory_space<vmem>>, vector<8x128xf32>,
    return
  }
  func.func @transform_0(%arg0: i32) -> (i32, i32) {
    %c0_i32 = arith.constant 0 : i32
    %c0_i32_0 = arith.constant 0 : i32
    return %c0_i32, %arg0 : i32, i32
  }
  func.func @transform_1(%arg0: i32) -> (i32, i32) {
    %c0_i32 = arith.constant 0 : i32
    %c0_i32_0 = arith.constant 0 : i32
    %c0_i32_1 = arith.constant 0 : i32
    return %c0_i32, %c0_i32_0 : i32, i32
  }
  func.func @transform_2(%arg0: i32) -> (i32, i32) {
    %c0_i32 = arith.constant 0 : i32
    %c0_i32_0 = arith.constant 0 : i32
    %c0_i32_1 = arith.constant 0 : i32
    return %c0_i32, %c0_i32_0 : i32, i32
  }
  func.func @transform_3(%arg0: i32) -> (i32, i32) {
    %c0_i32 = arith.constant 0 : i32
    %c0_i32_0 = arith.constant 0 : i32
    %c0_i32_1 = arith.constant 0 : i32
    return %c0_i32, %c0_i32_0 : i32, i32
  }
  func.func @transform_4(%arg0: i32) -> (i32, i32) {
    %c0_i32 = arith.constant 0 : i32
    %c0_i32_0 = arith.constant 0 : i32
    %c0_i32_1 = arith.constant 0 : i32
    return %c0_i32, %c0_i32_0 : i32, i32
  }
  func.func @transform_5(%arg0: i32) -> (i32, i32) {
    %c0_i32 = arith.constant 0 : i32
    %c0_i32_0 = arith.constant 0 : i32
    return %c0_i32, %arg0 : i32, i32
  }
}

</mosaic_0001>

<bundles_post_ra>
// kernel: tpu_custom_call.1
= control target key start
LH: loop header
LB: loop body
LE: loop exit
PB: predicated region body
PF: predicated region fallthrough
CT: control target
= control target key end

     0   :  { %vm75_vm0 = vcmask 1040384   ;;  %v394_v2 = vmov 0   ;;  %vm62_vm1 = vcmask 138240   ;;  %s473_s0 = inlined_call_operand.vmem [shape: bf16[17,128], index: 0, kind: input, shape index: {}]   ;;  %s474_s1 = inlined_call_operand.vmem [shape: bf16[64,17], index: 1, kind: input, shape index: {}]   ;;  %s475_s2 = inlined_call_operand.vmem [shape: bf16[32,32], index: 2, kind: input, shape index: {}]   ;;  %s476_s3 = inlined_call_operand.vmem [shape: bf16[8,32], index: 3, kind: input, shape index: {}]   ;;  %s477_s4 = inlined_call_operand.vmem [shape: f32[8,1], index: 4, kind: input, shape index: {}]   ;;  %s478_s5 = inlined_call_operand.hbm [shape: f32[8,128], index: 5, kind: output, shape index: {}]  }
   0x1   :  { %v362_v0 = vld [vmem:[%s473_s0] sm:$0xff]   ;;  %v363_v1 = vld [vmem:[%s473_s0 + $0x8] ss:$0 sps:$4 sm:$0x11]   ;;  %v77_v3 = vsel %vm75_vm0, 65535, %v394_v2  ;;  %361 = vset.pattern.permute.xlu0 %v394_v2 }
   0x2   :  { %321 = vmatprep.subr.bf16.mxu0 %v362_v0  ;;  %v364_v4 = vld [vmem:[%s474_s1] sm:$0xff]   ;;  %349 = vmatprep.subr.bf16.mxu1 %v362_v0  ;;  %v79_v5 = vand.u32 %v363_v1, %v77_v3  ;;  %v365_v6 = vld [vmem:[%s474_s1 + $0x8] sm:$0xff]  }
   0x3   :  { %322 = vmatpush3.bf16.msra.mxu0 %v362_v0  ;;  %351 = vmatpush3.bf16.msra.mxu1 %v362_v0 }
   0x4   :  { %325 = vmatprep.mubr.msk.bf16.mxu0 %vm62_vm1, %v364_v4  ;;  %323 = vmatprep.subr.bf16.mxu0 %v79_v5 }
   0x5   :  { %350 = vmatprep.subr.bf16.mxu1 %v79_v5 }
   0x6   :  { %10 = vsyncpa [#allocation3], 0  ;;  %v366_v7 = vld [vmem:[%s474_s1 + $0x10] sm:$0xff]   ;;  %v367_v8 = vld [vmem:[%s474_s1 + $0x18] sm:$0xff]   ;;  %vm166_vm2 = vcmask 261120   ;;  %v395_v25 = vmov 0.0  }
   0x7   :  { %324 = vmatpush3.bf16.msra.mxu0 %v79_v5  ;;  %352 = vmatpush3.bf16.msra.mxu1 %v79_v5  ;;  %v368_v9 = vld [vmem:[%s475_s2] sm:$0xff]   ;;  %v369_v20 = vld [vmem:[%s475_s2 + $0x8] sm:$0xff]   ;;  %vm396_vm3 = vmmov 0   ;;  %s397_s9 = smov [#allocation2]  }
   0x8   :  { %329 = vmatprep.mubr.msk.bf16.mxu1 %vm62_vm1, %v366_v7  ;;  %341 = vmatprep.subr.bf16.mxu1 %v395_v25  ;;  %v229_v26 = vld [vmem:[%s477_s4] sm:$0xff]  ;;  %s285_s10 = sshll.u32 %s397_s9, 4  ;;  %s286_s10 = int_to_ptr.vmem [resolvable:$true] %s285_s10 }
   0x9   :  { %232 = vperm.xlu0 %361, %v229_v26   ;;  %v226_v41 = vld [vmem:[%s476_s3] sm:$0xf]  ;;  %s370_s11 = scalar_lea.vmem %s286_s10, 128  ;;  %p375_p1 = scmp.lt.s32.totalorder %s286_s10, %s286_s10 }
   0xa   :  { %326 = vmatmul.mubr.msk.bf16.vlgmr.msra.gmra.mrb[0].mxu0 %vm62_vm1, %v365_v6  ;;  %330 = vmatmul.mubr.msk.bf16.vlgmr.msra.gmra.mrb[0].mxu1 %vm62_vm1, %v367_v8  ;;  %p371_p0 = scmp.ne.s32.totalorder %s286_s10, %s370_s11  ;;  %p376_p2 = scmp.lt.s32.totalorder %s370_s11, %s370_s11 }
   0xb   :  { %337 = vmatprep.mubr.msk.bf16.mxu0 %vm166_vm2, %v368_v9  ;;  %345 = vmatprep.mubr.msk.bf16.mxu1 %vm396_vm3, %v395_v25 }
   0xc   :  { %p377_p3 = por %p376_p2, %p375_p1 }
   0xe   :  { %p378_p4 = pnand %p377_p3, %p371_p0 }
  0x88   :  { %v233_v42 = vpop.permute.xlu0 %232 }
  0xdd   :  { %v327_v10 = vpop.f32.mrb[0].mxu0  ;;  %v331_v21 = vpop.f32.mrb[0].mxu1 }
  0xde   :  { %v115_v11 = vpop.f32.mrb[1].mxu0  ;;  %v148_v13 = vmax.f32 %v327_v10, 0.0  ;;  %v131_v22 = vpop.f32.mrb[1].mxu1 }
  0xdf   :  { %v328_v12 = vpop.f32.mrb[2].mxu0  ;;  %v146_v16 = vmax.f32 %v115_v11, 0.0  ;;  %v332_v23 = vpop.f32.mrb[2].mxu1 }
  0xe0   :  { %v149_v14 = vmax.f32 %v328_v12, 0.0  ;;  %v118_v15 = vpop.f32.mrb[3].mxu0  ;;  %v134_v24 = vpop.f32.mrb[3].mxu1 }
  0xe1   :  { %v147_v17 = vmax.f32 %v118_v15, 0.0 }
  0xe2   :  { %v155_v18 = vpack.c.bf16 %v149_v14, %v148_v13 }
  0xe3   :  { %v154_v19 = vpack.c.bf16 %v147_v17, %v146_v16 }
  0xe5   :  { %333 = vmatprep.subr.bf16.mxu0 %v154_v19 }
  0xe6   :  { %334 = vmatpush3.bf16.msra.mxu0 %v154_v19 }
  0xe7   :  { %335 = vmatprep.subr.bf16.mxu0 %v155_v18 }
  0xea   :  { %336 = vmatpush3.bf16.msra.mxu0 %v155_v18 }
  0xed   :  { %338 = vmatmul.mubr.msk.bf16.vlgmr.msra.gmra.mrb[4].mxu0 %vm166_vm2, %v369_v20 }
 0x1c0   :  { %v339_v27 = vpop.f32.mrb[4].mxu0 }
 0x1c1   :  { %v216_v28 = vadd.f32 %v339_v27, %v331_v21  ;;  %v207_v29 = vpop.f32.mrb[5].mxu0 }
 0x1c2   :  { %v208_v30 = vadd.f32 %v207_v29, %v131_v22  ;;  %v340_v31 = vpop.f32.mrb[6].mxu0 }
 0x1c3   :  { %v219_v32 = vadd.f32 %v340_v31, %v332_v23  ;;  %v210_v33 = vpop.f32.mrb[7].mxu0  ;;  %v224_v35 = vmax.f32 %v216_v28, 0.0 }
 0x1c4   :  { %v211_v34 = vadd.f32 %v210_v33, %v134_v24  ;;  %v222_v37 = vmax.f32 %v208_v30, 0.0 }
 0x1c5   :  { %v225_v36 = vmax.f32 %v219_v32, 0.0 }
 0x1c6   :  { %v223_v38 = vmax.f32 %v211_v34, 0.0 }
 0x1c7   :  { %v228_v39 = vpack.c.bf16 %v225_v36, %v224_v35 }
 0x1c8   :  { %v227_v40 = vpack.c.bf16 %v223_v38, %v222_v37 }
 0x1ca   :  { %342 = vmatpush3.bf16.msra.mxu1 %v227_v40 }
 0x1cb   :  { %343 = vmatprep.subr.bf16.mxu1 %v395_v25 }
 0x1ce   :  { %344 = vmatpush3.bf16.msra.mxu1 %v228_v39 }
 0x1d1   :  { %346 = vmatmul.mubr.msk.bf16.vlgmr.msra.gmra.mrb[4].mxu1 %vm166_vm2, %v226_v41 }
 0x2a4   :  { %v272_v43 = vpop.f32.mrb[4].mxu1 }
 0x2a5   :  { %v273_v44 = vadd.f32 %v272_v43, %v233_v42  ;;  %v347_v45 = vpop.f32.mrb[5].mxu1 }
 0x2a6   :  { %v275_v46 = vpop.f32.mrb[6].mxu1 }
 0x2a7   :  { %278 = vst [vmem:[#allocation2] sm:$0xff] %v273_v44  ;;  %v348_v47 = vpop.f32.mrb[7].mxu1 }
 0x2a8   :  { %381 = shalt.err (!%p378_p4)
}
 0x2a9   :  { %s382_s13 = scalar_lea.hbm %s478_s5, 128 }
 0x2aa   :  { %p383_p5 = scmp.ne.s32.totalorder %s478_s5, %s382_s13  ;;  %p386_p6 = scmp.lt.u32.totalorder %s382_s13, %s478_s5 }
 0x2ac   :  { %p388_p7 = pnand %p386_p6, %p383_p5 }
 0x2ae   :  { %391 = shalt.err (!%p388_p7)
}
 0x2af   :  { %288 = dma.vmem_to_hbm [thread:$0]  %s286_s10, 128, %s478_s5, [#allocation3]  }
 0x2b0   :  { %392 = dma.done.wait [#allocation3], 128  }
 0x2b1   :  { %393 = vsyncadd [#allocation3], 4294967168 }
 0x2b2   :  { %292 = vsyncpa [#allocation3], 1 }

</bundles_post_ra>
